<compile_context>
chip_gen: v6e
topology: v6e:2x2x1
jax: 0.10.0
libtpu: 0.0.40
codegen_flags: <defaults>
</compile_context>

<pallas_src>
import functools

import jax
import jax.numpy as jnp
from jax.experimental import pallas as pl
from jax.experimental.pallas import tpu as pltpu


def _pool_kernel(x_ref, avg_ref, max_ref, *, hw, tc, mask_cols):
    """Accumulate row-wise sum and max of x over the tiled column axis."""
    j = pl.program_id(1)

    @pl.when(j == 0)
    def _():
        avg_ref[...] = jnp.zeros_like(avg_ref)
        max_ref[...] = jnp.full_like(max_ref, -jnp.inf)

    x = x_ref[...].astype(jnp.float32)
    if mask_cols:
        col = j * tc + jax.lax.broadcasted_iota(jnp.int32, x.shape, 1)
        valid = col < hw
        x_sum = jnp.where(valid, x, 0.0)
        x_max = jnp.where(valid, x, -jnp.inf)
    else:
        x_sum = x
        x_max = x

    avg_ref[...] += jnp.sum(x_sum, axis=1, keepdims=True)
    max_ref[...] = jnp.maximum(max_ref[...],
                               jnp.max(x_max, axis=1, keepdims=True))

    @pl.when(j == pl.num_programs(1) - 1)
    def _():
        avg_ref[...] = avg_ref[...] * (1.0 / hw)


def _mlp_kernel(avg_ref, max_ref, w1_ref, w2_ref, o_ref):
    """Shared 2-layer MLP (1x1 convs) applied to both pooled vectors + sigmoid."""
    w1 = w1_ref[...]          # (C, hidden)
    w2 = w2_ref[...]          # (hidden, C)

    def mlp(p):               # p: (N, C) f32
        h = jnp.maximum(jnp.dot(p, w1, preferred_element_type=jnp.float32), 0.0)
        return jnp.dot(h, w2, preferred_element_type=jnp.float32)

    out = mlp(avg_ref[...]) + mlp(max_ref[...])
    o_ref[...] = jax.nn.sigmoid(out).astype(o_ref.dtype)


def _pick_tile(dim, unit, cap):
    """Largest multiple of `unit` that divides `dim` (itself a multiple of
    `unit`) and does not exceed `cap`."""
    q = dim // unit
    cap_q = max(1, min(q, cap // unit))
    best = 1
    for d in range(1, cap_q + 1):
        if q % d == 0:
            best = d
    return best * unit


def channel_attention(x, w1, w2, *, block_bytes=2 * 1024 * 1024):
    """ChannelAttention forward.

    x:  (N, C, H, W)
    w1: (hidden, C)  -- fc1 conv weight with the trailing 1x1 squeezed
    w2: (C, hidden)  -- fc2 conv weight with the trailing 1x1 squeezed
    Returns sigmoid(fc2(relu(fc1(avgpool(x)))) + fc2(relu(fc1(maxpool(x)))))
    of shape (N, C, 1, 1).
    """
    N, C, H, W = x.shape
    hidden = w1.shape[0]
    assert w1.shape == (hidden, C) and w2.shape == (C, hidden)

    rows, cols = N * C, H * W
    x2d = x.reshape(rows, cols)

    # Minimal padding only when required by the (8, 128) tiling constraint.
    rows_p = -(-rows // 8) * 8
    cols_p = -(-cols // 128) * 128
    if (rows_p, cols_p) != (rows, cols):
        x2d = jnp.pad(x2d, ((0, rows_p - rows), (0, cols_p - cols)))
    mask_cols = cols_p != cols

    # Large lane-dense blocks (~block_bytes of f32 working set) that divide
    # the padded dims exactly.
    tc = _pick_tile(cols_p, 128, min(cols_p, 4096))
    max_tr = max(8, (block_bytes // 4) // tc)
    tr = _pick_tile(rows_p, 8, min(rows_p, max_tr))

    grid = (rows_p // tr, cols_p // tc)
    pool_kernel = functools.partial(_pool_kernel, hw=cols, tc=tc,
                                    mask_cols=mask_cols)

    avg_p, max_p = pl.pallas_call(
        pool_kernel,
        out_shape=(jax.ShapeDtypeStruct((rows_p, 1), jnp.float32),
                   jax.ShapeDtypeStruct((rows_p, 1), jnp.float32)),
        grid_spec=pltpu.PrefetchScalarGridSpec(
            num_scalar_prefetch=0,
            grid=grid,
            in_specs=[pl.BlockSpec((tr, tc), lambda i, j: (i, j))],
            out_specs=(pl.BlockSpec((tr, 1), lambda i, j: (i, 0)),
                       pl.BlockSpec((tr, 1), lambda i, j: (i, 0))),
        ),
        compiler_params=pltpu.CompilerParams(
            dimension_semantics=("parallel", "arbitrary")),
        cost_estimate=pl.CostEstimate(
            flops=int(2 * rows_p * cols_p),
            transcendentals=0,
            bytes_accessed=int(rows_p * cols_p * x2d.dtype.itemsize
                               + 8 * rows_p)),
    )(x2d)

    avg_nc = avg_p[:rows].reshape(N, C)   # (N, C) f32
    max_nc = max_p[:rows].reshape(N, C)   # (N, C) f32

    # Tiny shared-MLP + sigmoid: single invocation, everything in VMEM.
    gate = pl.pallas_call(
        _mlp_kernel,
        out_shape=jax.ShapeDtypeStruct((N, C), x.dtype),
        in_specs=[pl.BlockSpec(memory_space=pltpu.MemorySpace.VMEM)] * 4,
        out_specs=pl.BlockSpec(memory_space=pltpu.MemorySpace.VMEM),
    )(avg_nc, max_nc,
      w1.T.astype(jnp.float32),     # (C, hidden)
      w2.T.astype(jnp.float32))     # (hidden, C)

    return gate.reshape(N, C, 1, 1)


def _channel_attention_ref(x, w1, w2):
    xf = x.astype(jnp.float32)
    avg = jnp.mean(xf, axis=(2, 3))
    mx = jnp.max(xf, axis=(2, 3))

    def mlp(p):
        h = jnp.maximum(
            jnp.dot(p, w1.T.astype(jnp.float32),
                    precision=jax.lax.Precision.HIGHEST), 0.0)
        return jnp.dot(h, w2.T.astype(jnp.float32),
                       precision=jax.lax.Precision.HIGHEST)

    out = jax.nn.sigmoid(mlp(avg) + mlp(mx)).astype(x.dtype)
    return out.reshape(x.shape[0], x.shape[1], 1, 1)


if __name__ == "__main__":
    key = jax.random.PRNGKey(0)
    k1, k2, k3 = jax.random.split(key, 3)

    # NOTE: the PyTorch module hard-codes hidden = in_planes // 16 (it ignores
    # the `ratio` arg), so C must be a multiple of 16 for the module itself to
    # be well-formed.  Use a small but valid C=64 (hidden=4).
    N, C, H, W = 2, 64, 16, 16
    hidden = C // 16

    x = jax.random.normal(k1, (N, C, H, W), dtype=jnp.float32)
    w1 = jax.random.normal(k2, (hidden, C), dtype=jnp.float32) * 0.2   # fc1
    w2 = jax.random.normal(k3, (C, hidden), dtype=jnp.float32) * 0.2   # fc2

    out = channel_attention(x, w1, w2)
    jax.block_until_ready(out)

    ref = _channel_attention_ref(x, w1, w2)
    assert out.shape == (N, C, 1, 1) and out.dtype == x.dtype
    err = jnp.max(jnp.abs(out.astype(jnp.float32) - ref.astype(jnp.float32)))
    assert jnp.allclose(out, ref, atol=1e-4, rtol=1e-4), f"mismatch: {err}"

    print("KERNEL_OK")
</pallas_src>

<mosaic_0001>
module attributes {stable_mosaic.version = 11 : i64} {
  func.func @_pool_kernel(%arg0: i32, %arg1: i32, %arg2: memref<128x256xf32, #tpu.memory_space<vmem>>, %arg3: memref<128x1xf32, #tpu.memory_space<vmem>>, %arg4: memref<128x1xf32, #tpu.memory_space<vmem>>) attributes {dimension_semantics = [#tpu.dimension_semantics<parallel>, #tpu.dimension_semantics<arbitrary>], iteration_bounds = array<i64: 1, 1>, scalar_prefetch = 0 : i64, scratch_operands = 0 : i64, tpu.core_type = #tpu.core_type<tc>, window_params = [{transform_indices = @transform_0, window_bounds = array<i64: 128, 256>}, {transform_indices = @transform_1, window_bounds = array<i64: 128, 1>}, {transform_indices = @transform_2, window_bounds = array<i64: 128, 1>}]} {
    %c0_i32 = arith.constant 0 : i32
    %0 = arith.cmpi eq, %arg1, %c0_i32 : i32
    %1 = arith.extui %0 : i1 to i32
    %c0_i32_0 = arith.constant 0 : i32
    %2 = arith.cmpi ne, %1, %c0_i32_0 : i32
    scf.if %2 {
      %cst_13 = arith.constant 0.000000e+00 : f32
      %17 = vector.broadcast %cst_13 : f32 to vector<128x1xf32>
      %c0_14 = arith.constant 0 : index
      %c0_15 = arith.constant 0 : index
      %18 = vector.load %arg3[%c0_14, %c0_15] : memref<128x1xf32, #tpu.memory_space<vmem>>, vector<128x1xf32>
      tpu.vector_store %arg3[%c0_14, %c0_15], %17 {strides = array<i32>} : memref<128x1xf32, #tpu.memory_space<vmem>>, vector<128x1xf32>,
      %cst_16 = arith.constant 0xFF800000 : f32
      %19 = vector.broadcast %cst_16 : f32 to vector<128x1xf32>
      %c0_17 = arith.constant 0 : index
      %c0_18 = arith.constant 0 : index
      %20 = vector.load %arg4[%c0_17, %c0_18] : memref<128x1xf32, #tpu.memory_space<vmem>>, vector<128x1xf32>
      tpu.vector_store %arg4[%c0_17, %c0_18], %19 {strides = array<i32>} : memref<128x1xf32, #tpu.memory_space<vmem>>, vector<128x1xf32>,
    } else {
    }
    %c0 = arith.constant 0 : index
    %c0_1 = arith.constant 0 : index
    %3 = vector.load %arg2[%c0, %c0_1] : memref<128x256xf32, #tpu.memory_space<vmem>>, vector<128x256xf32>
    %c0_2 = arith.constant 0 : index
    %c0_3 = arith.constant 0 : index
    %4 = vector.load %arg3[%c0_2, %c0_3] : memref<128x1xf32, #tpu.memory_space<vmem>>, vector<128x1xf32>
    %cst = arith.constant dense<0.000000e+00> : vector<128xf32>
    %5 = vector.multi_reduction <add>, %3, %cst [1] : vector<128x256xf32> to vector<128xf32>
    %6 = vector.shape_cast %5 : vector<128xf32> to vector<128x1xf32>
    %7 = arith.addf %4, %6 : vector<128x1xf32>
    %c0_4 = arith.constant 0 : index
    %c0_5 = arith.constant 0 : index
    %8 = vector.load %arg3[%c0_4, %c0_5] : memref<128x1xf32, #tpu.memory_space<vmem>>, vector<128x1xf32>
    tpu.vector_store %arg3[%c0_4, %c0_5], %7 {strides = array<i32>} : memref<128x1xf32, #tpu.memory_space<vmem>>, vector<128x1xf32>,
    %c0_6 = arith.constant 0 : index
    %c0_7 = arith.constant 0 : index
    %9 = vector.load %arg4[%c0_6, %c0_7] : memref<128x1xf32, #tpu.memory_space<vmem>>, vector<128x1xf32>
    %cst_8 = arith.constant dense<0xFF800000> : vector<128xf32>
    %10 = vector.multi_reduction <maximumf>, %3, %cst_8 [1] : vector<128x256xf32> to vector<128xf32>
    %11 = vector.shape_cast %10 : vector<128xf32> to vector<128x1xf32>
    %12 = arith.maximumf %9, %11 : vector<128x1xf32>
    %c0_9 = arith.constant 0 : index
    %c0_10 = arith.constant 0 : index
    %13 = vector.load %arg4[%c0_9, %c0_10] : memref<128x1xf32, #tpu.memory_space<vmem>>, vector<128x1xf32>
    tpu.vector_store %arg4[%c0_9, %c0_10], %12 {strides = array<i32>} : memref<128x1xf32, #tpu.memory_space<vmem>>, vector<128x1xf32>,
    %c0_i32_11 = arith.constant 0 : i32
    %14 = arith.cmpi eq, %arg1, %c0_i32_11 : i32
    %15 = arith.extui %14 : i1 to i32
    %c0_i32_12 = arith.constant 0 : i32
    %16 = arith.cmpi ne, %15, %c0_i32_12 : i32
    scf.if %16 {
      %c0_13 = arith.constant 0 : index
      %c0_14 = arith.constant 0 : index
      %17 = vector.load %arg3[%c0_13, %c0_14] : memref<128x1xf32, #tpu.memory_space<vmem>>, vector<128x1xf32>
      %cst_15 = arith.constant 3.906250e-03 : f32
      %18 = vector.broadcast %cst_15 : f32 to vector<128x1xf32>
      %19 = arith.mulf %17, %18 : vector<128x1xf32>
      %c0_16 = arith.constant 0 : index
      %c0_17 = arith.constant 0 : index
      %20 = vector.load %arg3[%c0_16, %c0_17] : memref<128x1xf32, #tpu.memory_space<vmem>>, vector<128x1xf32>
      tpu.vector_store %arg3[%c0_16, %c0_17], %19 {strides = array<i32>} : memref<128x1xf32, #tpu.memory_space<vmem>>, vector<128x1xf32>,
    } else {
    }
    return
  }
  func.func @transform_0(%arg0: i32, %arg1: i32) -> (i32, i32) {
    %c0_i32 = arith.constant 0 : i32
    return %arg0, %arg1 : i32, i32
  }
  func.func @transform_1(%arg0: i32, %arg1: i32) -> (i32, i32) {
    %c0_i32 = arith.constant 0 : i32
    %c0_i32_0 = arith.constant 0 : i32
    return %arg0, %c0_i32 : i32, i32
  }
  func.func @transform_2(%arg0: i32, %arg1: i32) -> (i32, i32) {
    %c0_i32 = arith.constant 0 : i32
    %c0_i32_0 = arith.constant 0 : i32
    return %arg0, %c0_i32 : i32, i32
  }
}

</mosaic_0001>

<bundles_post_ra>
// kernel: tpu_custom_call.1
= control target key start
LH: loop header
LB: loop body
LE: loop exit
PB: predicated region body
PF: predicated region fallthrough
CT: control target
= control target key end

     0   :  { %8 = vsyncpa [#allocation3], 0  ;;  %s373_s9 = smov [#allocation2]   ;;  %s948_s0 = inlined_call_operand.hbm [shape: f32[128,256], index: 0, kind: input, shape index: {}]   ;;  %s949_s1 = inlined_call_operand.vmem [shape: f32[128,1], index: 1, kind: output, shape index: {0}]   ;;  %s950_s2 = inlined_call_operand.vmem [shape: f32[128,1], index: 2, kind: output, shape index: {1}]  }
   0x1   :  { %s14_s10 = sshll.u32 %s373_s9, 4  ;;  %s15_s10 = int_to_ptr.vmem [resolvable:$true] %s14_s10 }
   0x2   :  { %s359_s11 = scalar_lea.vmem %s15_s10, 4096  ;;  %p364_p1 = scmp.lt.s32.totalorder %s15_s10, %s15_s10 }
   0x3   :  { %p360_p0 = scmp.ne.s32.totalorder %s15_s10, %s359_s11  ;;  %p365_p2 = scmp.lt.s32.totalorder %s359_s11, %s359_s11 }
   0x5   :  { %p366_p3 = por %p365_p2, %p364_p1 }
   0x7   :  { %p367_p4 = pnand %p366_p3, %p360_p0 }
   0x9   :  { %370 = shalt.err (!%p367_p4)
}
   0xa   :  { %s374_s12 = smov 256   ;;  %s375_s13 = smov 16  }
   0xb   :  { %20 = dma.hbm_to_vmem [thread:$0]  %s948_s0, 4096, %s15_s10, [#allocation3], %s374_s12, %s374_s12, %s375_s13  }
   0xc   :  { %371 = dma.done.wait [#allocation3], 4096  }
   0xd   :  { %372 = vsyncadd [#allocation3], 4294963200  ;;  %vm28_vm0 = vcmask 7168   ;;  %v376_v0 = vmov 0.0   ;;  %v460_v1 = vld [vmem:[#allocation2 + $0x20] sm:$0xff]  ;;  %v462_v2 = vld [vmem:[#allocation2 + $0x28] sm:$0xff] }
   0xe   :  { %31 = vst.msk [vmem:[%s949_s1 + $0x10] sm:$0xff] %vm28_vm0, %v376_v0  ;;  %29 = vst.msk [vmem:[%s949_s1] sm:$0xff] %vm28_vm0, %v376_v0  ;;  %v464_v3 = vld [vmem:[#allocation2] sm:$0xff]  ;;  %v115_v4 = vadd.f32 %v462_v2, %v460_v1  ;;  %v468_v5 = vld [vmem:[#allocation2 + $0x8] sm:$0xff]  ;;  %v212_v52 = vmax.f32 %v460_v1, %v462_v2  ;;  %v377_v53 = vmov -inf  }
   0xf   :  { %30 = vst.msk [vmem:[%s949_s1 + $0x8] sm:$0xff] %vm28_vm0, %v376_v0  ;;  %32 = vst.msk [vmem:[%s949_s1 + $0x18] sm:$0xff] %vm28_vm0, %v376_v0  ;;  %v470_v6 = vld [vmem:[#allocation2 + $0x30] sm:$0xff]  ;;  %v472_v7 = vld [vmem:[#allocation2 + $0x38] sm:$0xff]  ;;  %v109_v8 = vadd.f32 %v468_v5, %v464_v3  ;;  %v206_v50 = vmax.f32 %v464_v3, %v468_v5 }
  0x10   :  { %33 = vst.msk [vmem:[%s949_s1 + $0x20] sm:$0xff] %vm28_vm0, %v376_v0  ;;  %34 = vst.msk [vmem:[%s949_s1 + $0x28] sm:$0xff] %vm28_vm0, %v376_v0  ;;  %v63_v9 = vld [vmem:[#allocation2 + $0x10] sm:$0xff]  ;;  %v64_v10 = vld [vmem:[#allocation2 + $0x18] sm:$0xff]  ;;  %116 = vadd.xlane.f32.xlu1 %v115_v4  ;;  %v118_v11 = vadd.f32 %v472_v7, %v470_v6  ;;  %v215_v51 = vmax.f32 %v470_v6, %v472_v7 }
  0x11   :  { %35 = vst.msk [vmem:[%s949_s1 + $0x30] sm:$0xff] %vm28_vm0, %v376_v0  ;;  %36 = vst.msk [vmem:[%s949_s1 + $0x38] sm:$0xff] %vm28_vm0, %v376_v0  ;;  %110 = vadd.xlane.f32.xlu0 %v109_v8  ;;  %v112_v12 = vadd.f32 %v64_v10, %v63_v9  ;;  %v478_v13 = vld [vmem:[#allocation2 + $0x50] sm:$0xff]  ;;  %v480_v14 = vld [vmem:[#allocation2 + $0x58] sm:$0xff]  ;;  %v209_v49 = vmax.f32 %v63_v9, %v64_v10 }
  0x12   :  { %37 = vst.msk [vmem:[%s949_s1 + $0x40] sm:$0xff] %vm28_vm0, %v376_v0  ;;  %38 = vst.msk [vmem:[%s949_s1 + $0x48] sm:$0xff] %vm28_vm0, %v376_v0  ;;  %v482_v15 = vld [vmem:[#allocation2 + $0x40] sm:$0xff]  ;;  %v484_v16 = vld [vmem:[#allocation2 + $0x48] sm:$0xff]  ;;  %v124_v17 = vadd.f32 %v480_v14, %v478_v13  ;;  %v221_v54 = vmax.f32 %v478_v13, %v480_v14 }
  0x13   :  { %39 = vst.msk [vmem:[%s949_s1 + $0x50] sm:$0xff] %vm28_vm0, %v376_v0  ;;  %40 = vst.msk [vmem:[%s949_s1 + $0x58] sm:$0xff] %vm28_vm0, %v376_v0  ;;  %v121_v18 = vadd.f32 %v484_v16, %v482_v15  ;;  %v490_v19 = vld [vmem:[#allocation2 + $0x70] sm:$0xff]  ;;  %v492_v20 = vld [vmem:[#allocation2 + $0x78] sm:$0xff]  ;;  %v218_v55 = vmax.f32 %v482_v15, %v484_v16 }
  0x14   :  { %41 = vst.msk [vmem:[%s949_s1 + $0x60] sm:$0xff] %vm28_vm0, %v376_v0  ;;  %42 = vst.msk [vmem:[%s949_s1 + $0x68] sm:$0xff] %vm28_vm0, %v376_v0  ;;  %119 = vadd.xlane.f32.xlu1 %v118_v11  ;;  %v494_v21 = vld [vmem:[#allocation2 + $0x60] sm:$0xff]  ;;  %v496_v22 = vld [vmem:[#allocation2 + $0x68] sm:$0xff]  ;;  %v130_v23 = vadd.f32 %v492_v20, %v490_v19  ;;  %v227_v56 = vmax.f32 %v490_v19, %v492_v20 }
  0x15   :  { %43 = vst.msk [vmem:[%s949_s1 + $0x70] sm:$0xff] %vm28_vm0, %v376_v0  ;;  %44 = vst.msk [vmem:[%s949_s1 + $0x78] sm:$0xff] %vm28_vm0, %v376_v0  ;;  %113 = vadd.xlane.f32.xlu0 %v112_v12  ;;  %v127_v24 = vadd.f32 %v496_v22, %v494_v21  ;;  %v502_v25 = vld [vmem:[#allocation2 + $0x90] sm:$0xff]  ;;  %v504_v26 = vld [vmem:[#allocation2 + $0x98] sm:$0xff]  ;;  %v224_v57 = vmax.f32 %v494_v21, %v496_v22 }
  0x16   :  { %v506_v27 = vld [vmem:[#allocation2 + $0x80] sm:$0xff]  ;;  %v508_v28 = vld [vmem:[#allocation2 + $0x88] sm:$0xff]  ;;  %v136_v29 = vadd.f32 %v504_v26, %v502_v25  ;;  %v514_v31 = vld [vmem:[#allocation2 + $0xb0] sm:$0xff]  ;;  %46 = vst.msk [vmem:[%s950_s2 + $0x8] sm:$0xff] %vm28_vm0, %v377_v53  ;;  %v233_v58 = vmax.f32 %v502_v25, %v504_v26 }
  0x17   :  { %v133_v30 = vadd.f32 %v508_v28, %v506_v27  ;;  %v516_v32 = vld [vmem:[#allocation2 + $0xb8] sm:$0xff]  ;;  %v518_v33 = vld [vmem:[#allocation2 + $0xa0] sm:$0xff]  ;;  %v520_v34 = vld [vmem:[#allocation2 + $0xa8] sm:$0xff]  ;;  %45 = vst.msk [vmem:[%s950_s2] sm:$0xff] %vm28_vm0, %v377_v53  ;;  %v230_v59 = vmax.f32 %v506_v27, %v508_v28 }
  0x18   :  { %125 = vadd.xlane.f32.xlu1 %v124_v17  ;;  %v142_v35 = vadd.f32 %v516_v32, %v514_v31  ;;  %v139_v36 = vadd.f32 %v520_v34, %v518_v33  ;;  %v87_v37 = vld [vmem:[#allocation2 + $0xd0] sm:$0xff]  ;;  %v88_v38 = vld [vmem:[#allocation2 + $0xd8] sm:$0xff]  ;;  %v85_v39 = vld [vmem:[#allocation2 + $0xc0] sm:$0xff]  ;;  %47 = vst.msk [vmem:[%s950_s2 + $0x10] sm:$0xff] %vm28_vm0, %v377_v53  ;;  %v239_v60 = vmax.f32 %v514_v31, %v516_v32 }
  0x19   :  { %122 = vadd.xlane.f32.xlu0 %v121_v18  ;;  %v86_v40 = vld [vmem:[#allocation2 + $0xc8] sm:$0xff]  ;;  %v148_v41 = vadd.f32 %v88_v38, %v87_v37  ;;  %v91_v43 = vld [vmem:[#allocation2 + $0xf0] sm:$0xff]  ;;  %v92_v44 = vld [vmem:[#allocation2 + $0xf8] sm:$0xff]  ;;  %48 = vst.msk [vmem:[%s950_s2 + $0x18] sm:$0xff] %vm28_vm0, %v377_v53  ;;  %v236_v61 = vmax.f32 %v518_v33, %v520_v34  ;;  %v245_v62 = vmax.f32 %v87_v37, %v88_v38 }
  0x1a   :  { %v145_v42 = vadd.f32 %v86_v40, %v85_v39  ;;  %v89_v45 = vld [vmem:[#allocation2 + $0xe0] sm:$0xff]  ;;  %v90_v46 = vld [vmem:[#allocation2 + $0xe8] sm:$0xff]  ;;  %v154_v47 = vadd.f32 %v92_v44, %v91_v43  ;;  %49 = vst.msk [vmem:[%s950_s2 + $0x20] sm:$0xff] %vm28_vm0, %v377_v53  ;;  %50 = vst.msk [vmem:[%s950_s2 + $0x28] sm:$0xff] %vm28_vm0, %v377_v53  ;;  %v242_v63 = vmax.f32 %v85_v39, %v86_v40 }
  0x1b   :  { %v151_v48 = vadd.f32 %v90_v46, %v89_v45  ;;  %51 = vst.msk [vmem:[%s950_s2 + $0x30] sm:$0xff] %vm28_vm0, %v377_v53  ;;  %52 = vst.msk [vmem:[%s950_s2 + $0x38] sm:$0xff] %vm28_vm0, %v377_v53  ;;  %v251_v0 = vmax.f32 %v91_v43, %v92_v44  ;;  %v248_v1 = vmax.f32 %v89_v45, %v90_v46  ;;  %v95_v2 = vld [vmem:[%s949_s1 + $0x10] sm:$0xff]  ;;  %v93_v3 = vld [vmem:[%s949_s1] sm:$0xff] }
  0x1c   :  { %131 = vadd.xlane.f32.xlu1 %v130_v23  ;;  %53 = vst.msk [vmem:[%s950_s2 + $0x40] sm:$0xff] %vm28_vm0, %v377_v53  ;;  %54 = vst.msk [vmem:[%s950_s2 + $0x48] sm:$0xff] %vm28_vm0, %v377_v53  ;;  %v96_v8 = vld [vmem:[%s949_s1 + $0x18] sm:$0xff]  ;;  %v94_v9 = vld [vmem:[%s949_s1 + $0x8] sm:$0xff] }
  0x1d   :  { %128 = vadd.xlane.f32.xlu0 %v127_v24  ;;  %55 = vst.msk [vmem:[%s950_s2 + $0x50] sm:$0xff] %vm28_vm0, %v377_v53  ;;  %56 = vst.msk [vmem:[%s950_s2 + $0x58] sm:$0xff] %vm28_vm0, %v377_v53  ;;  %v98_v14 = vld [vmem:[%s949_s1 + $0x28] sm:$0xff]  ;;  %v97_v15 = vld [vmem:[%s949_s1 + $0x20] sm:$0xff] }
  0x1e   :  { %57 = vst.msk [vmem:[%s950_s2 + $0x60] sm:$0xff] %vm28_vm0, %v377_v53  ;;  %58 = vst.msk [vmem:[%s950_s2 + $0x68] sm:$0xff] %vm28_vm0, %v377_v53  ;;  %v100_v21 = vld [vmem:[%s949_s1 + $0x38] sm:$0xff]  ;;  %v99_v24 = vld [vmem:[%s949_s1 + $0x30] sm:$0xff] }
  0x1f   :  { %59 = vst.msk [vmem:[%s950_s2 + $0x70] sm:$0xff] %vm28_vm0, %v377_v53  ;;  %60 = vst.msk [vmem:[%s950_s2 + $0x78] sm:$0xff] %vm28_vm0, %v377_v53  ;;  %v102_v31 = vld [vmem:[%s949_s1 + $0x48] sm:$0xff]  ;;  %v101_v34 = vld [vmem:[%s949_s1 + $0x40] sm:$0xff] }
  0x20   :  { %137 = vadd.xlane.f32.xlu1 %v136_v29  ;;  %v103_v44 = vld [vmem:[%s949_s1 + $0x50] sm:$0xff] }
  0x21   :  { %134 = vadd.xlane.f32.xlu0 %v133_v30 }
  0x24   :  { %143 = vadd.xlane.f32.xlu1 %v142_v35 }
  0x25   :  { %140 = vadd.xlane.f32.xlu0 %v139_v36 }
  0x28   :  { %149 = vadd.xlane.f32.xlu1 %v148_v41  ;;  %v104_v41 = vld [vmem:[%s949_s1 + $0x58] sm:$0xff] }
  0x29   :  { %146 = vadd.xlane.f32.xlu0 %v145_v42 }
  0x2c   :  { %155 = vadd.xlane.f32.xlu1 %v154_v47 }
  0x2d   :  { %152 = vadd.xlane.f32.xlu0 %v151_v48 }
  0x30   :  { %210 = vmax.xlane.f32.xlu1 %v209_v49 }
  0x31   :  { %207 = vmax.xlane.f32.xlu0 %v206_v50 }
  0x34   :  { %216 = vmax.xlane.f32.xlu1 %v215_v51  ;;  %v106_v51 = vld [vmem:[%s949_s1 + $0x68] sm:$0xff] }
  0x35   :  { %213 = vmax.xlane.f32.xlu0 %v212_v52 }
  0x38   :  { %222 = vmax.xlane.f32.xlu1 %v221_v54  ;;  %v105_v54 = vld [vmem:[%s949_s1 + $0x60] sm:$0xff] }
  0x39   :  { %219 = vmax.xlane.f32.xlu0 %v218_v55 }
  0x3c   :  { %228 = vmax.xlane.f32.xlu1 %v227_v56 }
  0x3d   :  { %225 = vmax.xlane.f32.xlu0 %v224_v57 }
  0x40   :  { %234 = vmax.xlane.f32.xlu1 %v233_v58 }
  0x41   :  { %231 = vmax.xlane.f32.xlu0 %v230_v59 }
  0x44   :  { %240 = vmax.xlane.f32.xlu1 %v239_v60 }
  0x45   :  { %237 = vmax.xlane.f32.xlu0 %v236_v61  ;;  %v108_v61 = vld [vmem:[%s949_s1 + $0x78] sm:$0xff] }
  0x48   :  { %246 = vmax.xlane.f32.xlu1 %v245_v62 }
  0x49   :  { %243 = vmax.xlane.f32.xlu0 %v242_v63 }
  0x4c   :  { %252 = vmax.xlane.f32.xlu1 %v251_v0  ;;  %v107_v0 = vld [vmem:[%s949_s1 + $0x70] sm:$0xff] }
  0x4d   :  { %249 = vmax.xlane.f32.xlu0 %v248_v1 }
  0x99   :  { %v117_v4 = vpop.xlane.xlu1 %116 }
  0x9a   :  { %v159_v5 = vadd.f32 %v117_v4, %v95_v2  ;;  %v111_v6 = vpop.xlane.xlu0 %110 }
  0x9b   :  { %v157_v7 = vadd.f32 %v111_v6, %v93_v3 }
  0x9c   :  { %176 = vst.msk [vmem:[%s949_s1 + $0x10] sm:$0xff] %vm28_vm0, %v159_v5 }
  0x9d   :  { %174 = vst.msk [vmem:[%s949_s1] sm:$0xff] %vm28_vm0, %v157_v7  ;;  %v120_v10 = vpop.xlane.xlu1 %119  ;;  %v191_v7 = vld [vmem:[%s950_s2 + $0x8] sm:$0xff] }
  0x9e   :  { %v160_v11 = vadd.f32 %v120_v10, %v96_v8  ;;  %v114_v12 = vpop.xlane.xlu0 %113  ;;  %v190_v10 = vld [vmem:[%s950_s2] sm:$0xff] }
  0x9f   :  { %v158_v13 = vadd.f32 %v114_v12, %v94_v9 }
  0xa0   :  { %177 = vst.msk [vmem:[%s949_s1 + $0x18] sm:$0xff] %vm28_vm0, %v160_v11 }
  0xa1   :  { %175 = vst.msk [vmem:[%s949_s1 + $0x8] sm:$0xff] %vm28_vm0, %v158_v13  ;;  %v126_v16 = vpop.xlane.xlu1 %125 }
  0xa2   :  { %v162_v17 = vadd.f32 %v126_v16, %v98_v14  ;;  %v123_v18 = vpop.xlane.xlu0 %122 }
  0xa3   :  { %v291_v19 = vld [vmem:[%s949_s1 + $0x10] sm:$0xff]  ;;  %v161_v20 = vadd.f32 %v123_v18, %v97_v15 }
  0xa4   :  { %v307_v22 = vmul.f32 0.00390625, %v291_v19  ;;  %v289_v23 = vld [vmem:[%s949_s1] sm:$0xff]  ;;  %179 = vst.msk [vmem:[%s949_s1 + $0x28] sm:$0xff] %vm28_vm0, %v162_v17  ;;  %v193_v17 = vld [vmem:[%s950_s2 + $0x18] sm:$0xff] }
  0xa5   :  { %v305_v25 = vmul.f32 0.00390625, %v289_v23  ;;  %178 = vst.msk [vmem:[%s949_s1 + $0x20] sm:$0xff] %vm28_vm0, %v161_v20  ;;  %v132_v26 = vpop.xlane.xlu1 %131  ;;  %v192_v20 = vld [vmem:[%s950_s2 + $0x10] sm:$0xff] }
  0xa6   :  { %323 = vst.msk [vmem:[%s949_s1 + $0x10] sm:$0xff] %vm28_vm0, %v307_v22  ;;  %v164_v27 = vadd.f32 %v132_v26, %v100_v21  ;;  %v129_v28 = vpop.xlane.xlu0 %128 }
  0xa7   :  { %321 = vst.msk [vmem:[%s949_s1] sm:$0xff] %vm28_vm0, %v305_v25  ;;  %v292_v29 = vld [vmem:[%s949_s1 + $0x18] sm:$0xff]  ;;  %v163_v30 = vadd.f32 %v129_v28, %v99_v24 }
  0xa8   :  { %v308_v32 = vmul.f32 0.00390625, %v292_v29  ;;  %v290_v33 = vld [vmem:[%s949_s1 + $0x8] sm:$0xff]  ;;  %181 = vst.msk [vmem:[%s949_s1 + $0x38] sm:$0xff] %vm28_vm0, %v164_v27 }
  0xa9   :  { %v306_v35 = vmul.f32 0.00390625, %v290_v33  ;;  %180 = vst.msk [vmem:[%s949_s1 + $0x30] sm:$0xff] %vm28_vm0, %v163_v30  ;;  %v138_v36 = vpop.xlane.xlu1 %137  ;;  %v195_v27 = vld [vmem:[%s950_s2 + $0x28] sm:$0xff]  ;;  %v194_v30 = vld [vmem:[%s950_s2 + $0x20] sm:$0xff] }
  0xaa   :  { %324 = vst.msk [vmem:[%s949_s1 + $0x18] sm:$0xff] %vm28_vm0, %v308_v32  ;;  %v166_v37 = vadd.f32 %v138_v36, %v102_v31  ;;  %v135_v38 = vpop.xlane.xlu0 %134  ;;  %v197_v36 = vld [vmem:[%s950_s2 + $0x38] sm:$0xff] }
  0xab   :  { %322 = vst.msk [vmem:[%s949_s1 + $0x8] sm:$0xff] %vm28_vm0, %v306_v35  ;;  %v294_v39 = vld [vmem:[%s949_s1 + $0x28] sm:$0xff]  ;;  %v165_v40 = vadd.f32 %v135_v38, %v101_v34 }
  0xac   :  { %v310_v42 = vmul.f32 0.00390625, %v294_v39  ;;  %v293_v43 = vld [vmem:[%s949_s1 + $0x20] sm:$0xff]  ;;  %183 = vst.msk [vmem:[%s949_s1 + $0x48] sm:$0xff] %vm28_vm0, %v166_v37  ;;  %v196_v37 = vld [vmem:[%s950_s2 + $0x30] sm:$0xff] }
  0xad   :  { %v309_v45 = vmul.f32 0.00390625, %v293_v43  ;;  %182 = vst.msk [vmem:[%s949_s1 + $0x40] sm:$0xff] %vm28_vm0, %v165_v40  ;;  %v144_v46 = vpop.xlane.xlu1 %143  ;;  %v198_v43 = vld [vmem:[%s950_s2 + $0x40] sm:$0xff] }
  0xae   :  { %326 = vst.msk [vmem:[%s949_s1 + $0x28] sm:$0xff] %vm28_vm0, %v310_v42  ;;  %v168_v47 = vadd.f32 %v144_v46, %v104_v41  ;;  %v141_v48 = vpop.xlane.xlu0 %140  ;;  %v199_v42 = vld [vmem:[%s950_s2 + $0x48] sm:$0xff] }
  0xaf   :  { %325 = vst.msk [vmem:[%s949_s1 + $0x20] sm:$0xff] %vm28_vm0, %v309_v45  ;;  %v296_v49 = vld [vmem:[%s949_s1 + $0x38] sm:$0xff]  ;;  %v167_v50 = vadd.f32 %v141_v48, %v103_v44 }
  0xb0   :  { %v312_v52 = vmul.f32 0.00390625, %v296_v49  ;;  %v295_v53 = vld [vmem:[%s949_s1 + $0x30] sm:$0xff]  ;;  %185 = vst.msk [vmem:[%s949_s1 + $0x58] sm:$0xff] %vm28_vm0, %v168_v47  ;;  %v201_v48 = vld [vmem:[%s950_s2 + $0x58] sm:$0xff] }
  0xb1   :  { %v311_v55 = vmul.f32 0.00390625, %v295_v53  ;;  %184 = vst.msk [vmem:[%s949_s1 + $0x50] sm:$0xff] %vm28_vm0, %v167_v50  ;;  %v150_v56 = vpop.xlane.xlu1 %149  ;;  %v200_v49 = vld [vmem:[%s950_s2 + $0x50] sm:$0xff] }
  0xb2   :  { %328 = vst.msk [vmem:[%s949_s1 + $0x38] sm:$0xff] %vm28_vm0, %v312_v52  ;;  %v170_v57 = vadd.f32 %v150_v56, %v106_v51  ;;  %v147_v58 = vpop.xlane.xlu0 %146 }
  0xb3   :  { %327 = vst.msk [vmem:[%s949_s1 + $0x30] sm:$0xff] %vm28_vm0, %v311_v55  ;;  %v298_v59 = vld [vmem:[%s949_s1 + $0x48] sm:$0xff]  ;;  %v169_v60 = vadd.f32 %v147_v58, %v105_v54  ;;  %v202_v55 = vld [vmem:[%s950_s2 + $0x60] sm:$0xff] }
  0xb4   :  { %v314_v62 = vmul.f32 0.00390625, %v298_v59  ;;  %v297_v63 = vld [vmem:[%s949_s1 + $0x40] sm:$0xff]  ;;  %187 = vst.msk [vmem:[%s949_s1 + $0x68] sm:$0xff] %vm28_vm0, %v170_v57  ;;  %v203_v54 = vld [vmem:[%s950_s2 + $0x68] sm:$0xff] }
  0xb5   :  { %v313_v1 = vmul.f32 0.00390625, %v297_v63  ;;  %186 = vst.msk [vmem:[%s949_s1 + $0x60] sm:$0xff] %vm28_vm0, %v169_v60  ;;  %v156_v2 = vpop.xlane.xlu1 %155  ;;  %v205_v60 = vld [vmem:[%s950_s2 + $0x78] sm:$0xff] }
  0xb6   :  { %330 = vst.msk [vmem:[%s949_s1 + $0x48] sm:$0xff] %vm28_vm0, %v314_v62  ;;  %v172_v3 = vadd.f32 %v156_v2, %v108_v61  ;;  %v153_v4 = vpop.xlane.xlu0 %152  ;;  %v204_v61 = vld [vmem:[%s950_s2 + $0x70] sm:$0xff] }
  0xb7   :  { %329 = vst.msk [vmem:[%s949_s1 + $0x40] sm:$0xff] %vm28_vm0, %v313_v1  ;;  %v300_v5 = vld [vmem:[%s949_s1 + $0x58] sm:$0xff]  ;;  %v171_v6 = vadd.f32 %v153_v4, %v107_v0 }
  0xb8   :  { %v316_v8 = vmul.f32 0.00390625, %v300_v5  ;;  %v299_v9 = vld [vmem:[%s949_s1 + $0x50] sm:$0xff]  ;;  %189 = vst.msk [vmem:[%s949_s1 + $0x78] sm:$0xff] %vm28_vm0, %v172_v3 }
  0xb9   :  { %v315_v11 = vmul.f32 0.00390625, %v299_v9  ;;  %188 = vst.msk [vmem:[%s949_s1 + $0x70] sm:$0xff] %vm28_vm0, %v171_v6  ;;  %v211_v12 = vpop.xlane.xlu1 %210 }
  0xba   :  { %332 = vst.msk [vmem:[%s949_s1 + $0x58] sm:$0xff] %vm28_vm0, %v316_v8  ;;  %v255_v13 = vmax.f32 %v191_v7, %v211_v12  ;;  %v208_v14 = vpop.xlane.xlu0 %207 }
  0xbb   :  { %331 = vst.msk [vmem:[%s949_s1 + $0x50] sm:$0xff] %vm28_vm0, %v315_v11  ;;  %v302_v15 = vld [vmem:[%s949_s1 + $0x68] sm:$0xff]  ;;  %v254_v16 = vmax.f32 %v190_v10, %v208_v14 }
  0xbc   :  { %v318_v18 = vmul.f32 0.00390625, %v302_v15  ;;  %v301_v19 = vld [vmem:[%s949_s1 + $0x60] sm:$0xff]  ;;  %271 = vst.msk [vmem:[%s950_s2 + $0x8] sm:$0xff] %vm28_vm0, %v255_v13 }
  0xbd   :  { %v317_v21 = vmul.f32 0.00390625, %v301_v19  ;;  %270 = vst.msk [vmem:[%s950_s2] sm:$0xff] %vm28_vm0, %v254_v16  ;;  %v217_v22 = vpop.xlane.xlu1 %216 }
  0xbe   :  { %334 = vst.msk [vmem:[%s949_s1 + $0x68] sm:$0xff] %vm28_vm0, %v318_v18  ;;  %v257_v23 = vmax.f32 %v193_v17, %v217_v22  ;;  %v214_v24 = vpop.xlane.xlu0 %213 }
  0xbf   :  { %333 = vst.msk [vmem:[%s949_s1 + $0x60] sm:$0xff] %vm28_vm0, %v317_v21  ;;  %v304_v25 = vld [vmem:[%s949_s1 + $0x78] sm:$0xff]  ;;  %v256_v26 = vmax.f32 %v192_v20, %v214_v24 }
  0xc0   :  { %v320_v28 = vmul.f32 0.00390625, %v304_v25  ;;  %v303_v29 = vld [vmem:[%s949_s1 + $0x70] sm:$0xff]  ;;  %273 = vst.msk [vmem:[%s950_s2 + $0x18] sm:$0xff] %vm28_vm0, %v257_v23 }
  0xc1   :  { %v319_v31 = vmul.f32 0.00390625, %v303_v29  ;;  %272 = vst.msk [vmem:[%s950_s2 + $0x10] sm:$0xff] %vm28_vm0, %v256_v26  ;;  %v223_v32 = vpop.xlane.xlu1 %222 }
  0xc2   :  { %336 = vst.msk [vmem:[%s949_s1 + $0x78] sm:$0xff] %vm28_vm0, %v320_v28  ;;  %v259_v33 = vmax.f32 %v195_v27, %v223_v32  ;;  %v220_v34 = vpop.xlane.xlu0 %219 }
  0xc3   :  { %335 = vst.msk [vmem:[%s949_s1 + $0x70] sm:$0xff] %vm28_vm0, %v319_v31  ;;  %v258_v35 = vmax.f32 %v194_v30, %v220_v34 }
  0xc4   :  { %275 = vst.msk [vmem:[%s950_s2 + $0x28] sm:$0xff] %vm28_vm0, %v259_v33 }
  0xc5   :  { %274 = vst.msk [vmem:[%s950_s2 + $0x20] sm:$0xff] %vm28_vm0, %v258_v35  ;;  %v229_v38 = vpop.xlane.xlu1 %228 }
  0xc6   :  { %v261_v39 = vmax.f32 %v197_v36, %v229_v38  ;;  %v226_v40 = vpop.xlane.xlu0 %225 }
  0xc7   :  { %v260_v41 = vmax.f32 %v196_v37, %v226_v40 }
  0xc8   :  { %277 = vst.msk [vmem:[%s950_s2 + $0x38] sm:$0xff] %vm28_vm0, %v261_v39 }
  0xc9   :  { %276 = vst.msk [vmem:[%s950_s2 + $0x30] sm:$0xff] %vm28_vm0, %v260_v41  ;;  %v235_v44 = vpop.xlane.xlu1 %234 }
  0xca   :  { %v263_v45 = vmax.f32 %v199_v42, %v235_v44  ;;  %v232_v46 = vpop.xlane.xlu0 %231 }
  0xcb   :  { %v262_v47 = vmax.f32 %v198_v43, %v232_v46 }
  0xcc   :  { %279 = vst.msk [vmem:[%s950_s2 + $0x48] sm:$0xff] %vm28_vm0, %v263_v45 }
  0xcd   :  { %278 = vst.msk [vmem:[%s950_s2 + $0x40] sm:$0xff] %vm28_vm0, %v262_v47  ;;  %v241_v50 = vpop.xlane.xlu1 %240 }
  0xce   :  { %v265_v51 = vmax.f32 %v201_v48, %v241_v50  ;;  %v238_v52 = vpop.xlane.xlu0 %237 }
  0xcf   :  { %v264_v53 = vmax.f32 %v200_v49, %v238_v52 }
  0xd0   :  { %281 = vst.msk [vmem:[%s950_s2 + $0x58] sm:$0xff] %vm28_vm0, %v265_v51 }
  0xd1   :  { %280 = vst.msk [vmem:[%s950_s2 + $0x50] sm:$0xff] %vm28_vm0, %v264_v53  ;;  %v247_v56 = vpop.xlane.xlu1 %246 }
  0xd2   :  { %v267_v57 = vmax.f32 %v203_v54, %v247_v56  ;;  %v244_v58 = vpop.xlane.xlu0 %243 }
  0xd3   :  { %v266_v59 = vmax.f32 %v202_v55, %v244_v58 }
  0xd4   :  { %283 = vst.msk [vmem:[%s950_s2 + $0x68] sm:$0xff] %vm28_vm0, %v267_v57 }
  0xd5   :  { %282 = vst.msk [vmem:[%s950_s2 + $0x60] sm:$0xff] %vm28_vm0, %v266_v59  ;;  %v253_v62 = vpop.xlane.xlu1 %252 }
  0xd6   :  { %v269_v63 = vmax.f32 %v205_v60, %v253_v62  ;;  %v250_v0 = vpop.xlane.xlu0 %249 }
  0xd7   :  { %v268_v1 = vmax.f32 %v204_v61, %v250_v0 }
  0xd8   :  { %285 = vst.msk [vmem:[%s950_s2 + $0x78] sm:$0xff] %vm28_vm0, %v269_v63 }
  0xd9   :  { %284 = vst.msk [vmem:[%s950_s2 + $0x70] sm:$0xff] %vm28_vm0, %v268_v1 }
  0xda   :  { %345 = vsyncpa [#allocation3], 1 }

</bundles_post_ra>
